<compile_context>
chip_gen: v7x
topology: tpu7x:2x2x1
jax: 0.10.0
libtpu: 0.0.40
codegen_flags: <defaults>
</compile_context>

<pallas_src>
import functools

import jax
import jax.numpy as jnp
from jax import lax
from jax.experimental import pallas as pl
from jax.experimental.pallas import tpu as pltpu


def _cdiv(a, b):
    return -(-a // b)


def _sq_diff_partial_kernel(o_ref, t_ref, part_ref, *, tile_rows, sub, valid_rows):
    """Per-tile partial sum of squared differences (VPU-only leading-axis reduce)."""
    o = o_ref[...].astype(jnp.float32)
    t = t_ref[...].astype(jnp.float32)
    d = o - t
    if valid_rows % tile_rows != 0:
        # Ragged last row-tile: zero rows past the end of the (R, C) view so
        # undefined out-of-bounds block contents cannot contribute.  Cheap VPU
        # filler hidden under the HBM stream; emitted only when statically needed.
        i = pl.program_id(0)
        row = lax.broadcasted_iota(jnp.int32, d.shape, 0) + i * tile_rows
        d = jnp.where(row < valid_rows, d, jnp.float32(0.0))
    d2 = d * d
    # Reduce over the leading axis only: (tr, C) -> (tr//sub, sub, C) -> (sub, C)
    # via elementwise vreg adds (pure VPU; no per-step full XLU reduce, no SMEM
    # scalar read-modify-write).  Each step writes its own partial slot.
    part_ref[0] = d2.reshape(-1, sub, d2.shape[-1]).sum(axis=0)


def _step_budget_bytes():
    """Combined per-step input bytes; x2 (double buffering) must fit scoped VMEM."""
    try:
        kind = jax.devices()[0].device_kind.lower()
    except Exception:  # pragma: no cover - be safe on exotic backends
        kind = ""
    if ("v6" in kind) or ("7" in kind):
        return 8 * 1024 * 1024   # 16 MiB double-buffered < 32 MiB scoped default (v6e/v7x)
    return 4 * 1024 * 1024       # 8 MiB double-buffered; safe under v5e's 16 MiB default


def joints_mse_loss(output, target, target_weight=None):
    """Pallas implementation of JointsMSELoss.forward (target_weight unused by spec)."""
    B, J, H, W = output.shape
    n = J * H * W
    total = B * n
    # Matches the given module: per-sample mean over (J,H,W), summed over the
    # batch, divided by J at the end (no division by B in this spec).
    scale = 0.5 / (float(n) * float(J))

    # Free contiguous reshapes only (no HBM copy, no jnp.pad):
    #  * lane-dense (total//128, 128) slab when total % 128 == 0 (typical heatmaps)
    #  * otherwise (B*J*H, W): last dim equals the full array dim, so the
    #    BlockSpec stays legal and the ragged tail is handled by the row mask.
    if total % 128 == 0:
        R, C = total // 128, 128
    else:
        R, C = B * J * H, W
    o2 = output.reshape(R, C)
    t2 = target.reshape(R, C)

    # Dtype-aware sublane-packing multiple (f32: 8, bf16: 16, int8/fp8: 32).
    o_isz = jnp.dtype(output.dtype).itemsize
    t_isz = jnp.dtype(target.dtype).itemsize
    mult = max(8, 32 // max(1, min(o_isz, t_isz)))

    # Row tile from a per-step byte budget (amortizes the ~0.35 us step cost).
    c_pad = _cdiv(C, 128) * 128                      # VMEM lane padding for C < 128
    row_bytes = c_pad * (o_isz + t_isz)
    tr = max(mult, (_step_budget_bytes() // row_bytes) // mult * mult)
    if R <= tr:
        if R >= 2 * mult:
            # Split into exactly two steps so both v7x TensorCores get work.
            tr = _cdiv(_cdiv(R, 2), mult) * mult
        else:
            tr = R                                   # single full-dim block (always legal)
    steps = _cdiv(R, tr)

    # Per-lane partial-accumulator height (must divide tr).
    sub = next(s for s in (8, 4, 2, 1) if tr % s == 0)

    in_spec = pl.BlockSpec((tr, C), lambda i: (i, 0))
    out_spec = pl.BlockSpec((1, sub, C), lambda i: (i, 0, 0))

    partials = pl.pallas_call(
        functools.partial(
            _sq_diff_partial_kernel, tile_rows=tr, sub=sub, valid_rows=R
        ),
        out_shape=jax.ShapeDtypeStruct((steps, sub, C), jnp.float32),
        grid=(steps,),
        in_specs=[in_spec, in_spec],
        out_specs=out_spec,
        compiler_params=pltpu.CompilerParams(
            dimension_semantics=("parallel",),  # independent partials -> megacore on v7x
        ),
        cost_estimate=pl.CostEstimate(
            flops=3 * total,            # sub, mul, add per element
            transcendentals=0,
            bytes_accessed=total * (o_isz + t_isz) + steps * sub * C * 4,
        ),
    )(o2, t2)

    # Tiny final reduction + scale outside the hot loop.
    return jnp.sum(partials) * jnp.float32(scale)


def joints_mse_loss_ref(output, target):
    """Pure-JAX reference mirroring the PyTorch forward literally."""
    B, J = output.shape[0], output.shape[1]
    loss = 0.0
    for idx in range(B):
        diff = output[idx].astype(jnp.float32) - target[idx].astype(jnp.float32)
        loss = loss + 0.5 * jnp.mean(diff * diff)
    return loss / J


if __name__ == "__main__":
    key = jax.random.PRNGKey(0)
    k1, k2, k3, k4, k5, k6, k7, k8, k9 = jax.random.split(key, 9)

    # Case 1: small heatmaps, lane-dense fast path, 2 even steps, no mask.
    B, J, H, W = 2, 4, 16, 16
    output = jax.random.normal(k1, (B, J, H, W), dtype=jnp.float32)
    target = jax.random.normal(k2, (B, J, H, W), dtype=jnp.float32)
    target_weight = jax.random.uniform(k3, (B, J, 1), dtype=jnp.float32)  # unused by forward
    loss = jax.block_until_ready(joints_mse_loss(output, target, target_weight))
    ref = joints_mse_loss_ref(output, target)
    assert jnp.allclose(loss, ref, rtol=1e-5, atol=1e-6), (loss, ref)

    # Case 2: row count not a multiple of the tile -> exercises the ragged-row mask.
    out2 = jax.random.normal(k4, (2, 3, 24, 24), dtype=jnp.float32)
    tgt2 = jax.random.normal(k5, (2, 3, 24, 24), dtype=jnp.float32)
    loss2 = jax.block_until_ready(joints_mse_loss(out2, tgt2))
    ref2 = joints_mse_loss_ref(out2, tgt2)
    assert jnp.allclose(loss2, ref2, rtol=1e-5, atol=1e-6), (loss2, ref2)

    # Case 3: element count not a multiple of 128 -> copy-free (B*J*H, W) path
    #         (previously required a full jnp.pad copy of both inputs).
    out3 = jax.random.normal(k6, (2, 3, 5, 7), dtype=jnp.float32)
    tgt3 = jax.random.normal(k7, (2, 3, 5, 7), dtype=jnp.float32)
    loss3 = jax.block_until_ready(joints_mse_loss(out3, tgt3))
    ref3 = joints_mse_loss_ref(out3, tgt3)
    assert jnp.allclose(loss3, ref3, rtol=1e-5, atol=1e-6), (loss3, ref3)

    # Case 4: bf16 producers streamed without wrapper-side upcast (half the HBM bytes).
    out4 = jax.random.normal(k8, (2, 4, 16, 16), dtype=jnp.bfloat16)
    tgt4 = jax.random.normal(k9, (2, 4, 16, 16), dtype=jnp.bfloat16)
    loss4 = jax.block_until_ready(joints_mse_loss(out4, tgt4))
    ref4 = joints_mse_loss_ref(out4, tgt4)
    assert jnp.allclose(loss4, ref4, rtol=1e-4, atol=1e-6), (loss4, ref4)

    print("KERNEL_OK")
</pallas_src>

<mosaic_0001>
module attributes {stable_mosaic.version = 11 : i64} {
  func.func @_sq_diff_partial_kernel(%arg0: i32, %arg1: memref<8x128xf32, #tpu.memory_space<vmem>>, %arg2: memref<8x128xf32, #tpu.memory_space<vmem>>, %arg3: memref<1x8x128xf32, #tpu.memory_space<vmem>>) attributes {dimension_semantics = [#tpu.dimension_semantics<parallel>], iteration_bounds = array<i64: 2>, scalar_prefetch = 0 : i64, scratch_operands = 0 : i64, tpu.core_type = #tpu.core_type<tc>, window_params = [{transform_indices = @transform_0, window_bounds = array<i64: 8, 128>}, {transform_indices = @transform_1, window_bounds = array<i64: 8, 128>}, {transform_indices = @transform_2, window_bounds = array<i64: 1, 8, 128>}]} {
    %c0 = arith.constant 0 : index
    %c0_0 = arith.constant 0 : index
    %0 = vector.load %arg1[%c0, %c0_0] : memref<8x128xf32, #tpu.memory_space<vmem>>, vector<8x128xf32>
    %c0_1 = arith.constant 0 : index
    %c0_2 = arith.constant 0 : index
    %1 = vector.load %arg2[%c0_1, %c0_2] : memref<8x128xf32, #tpu.memory_space<vmem>>, vector<8x128xf32>
    %2 = arith.subf %0, %1 : vector<8x128xf32>
    %3 = arith.mulf %2, %2 : vector<8x128xf32>
    %4 = vector.shape_cast %3 : vector<8x128xf32> to vector<1x8x128xf32>
    %cst = arith.constant dense<0.000000e+00> : vector<8x128xf32>
    %5 = vector.multi_reduction <add>, %4, %cst [0] : vector<1x8x128xf32> to vector<8x128xf32>
    %c0_3 = arith.constant 0 : index
    %c0_4 = arith.constant 0 : index
    %c0_5 = arith.constant 0 : index
    %6 = vector.load %arg3[%c0_3, %c0_4, %c0_5] : memref<1x8x128xf32, #tpu.memory_space<vmem>>, vector<1x8x128xf32>
    %7 = vector.shape_cast %6 : vector<1x8x128xf32> to vector<8x128xf32>
    %8 = vector.shape_cast %5 : vector<8x128xf32> to vector<1x8x128xf32>
    tpu.vector_store %arg3[%c0_3, %c0_4, %c0_5], %8 {strides = array<i32>} : memref<1x8x128xf32, #tpu.memory_space<vmem>>, vector<1x8x128xf32>,
    return
  }
  func.func @transform_0(%arg0: i32) -> (i32, i32) {
    %c0_i32 = arith.constant 0 : i32
    %c0_i32_0 = arith.constant 0 : i32
    return %arg0, %c0_i32 : i32, i32
  }
  func.func @transform_1(%arg0: i32) -> (i32, i32) {
    %c0_i32 = arith.constant 0 : i32
    %c0_i32_0 = arith.constant 0 : i32
    return %arg0, %c0_i32 : i32, i32
  }
  func.func @transform_2(%arg0: i32) -> (i32, i32, i32) {
    %c0_i32 = arith.constant 0 : i32
    %c0_i32_0 = arith.constant 0 : i32
    %c0_i32_1 = arith.constant 0 : i32
    return %arg0, %c0_i32, %c0_i32_0 : i32, i32, i32
  }
}

</mosaic_0001>

<bundles_post_ra>
// kernel: tpu_custom_call.1
= control target key start
LH: loop header
LB: loop body
LE: loop exit
PB: predicated region body
PF: predicated region fallthrough
CT: control target
= control target key end

     0   :  { %7 = vsyncpa [#allocation3], 0  ;;  %s734_s0 = inlined_call_operand.hbm [shape: f32[16,128], index: 0, kind: input, shape index: {}]   ;;  %s735_s1 = inlined_call_operand.hbm [shape: f32[16,128], index: 1, kind: input, shape index: {}]   ;;  %s736_s2 = inlined_call_operand.hbm [shape: f32[2,8,128], index: 2, kind: output, shape index: {}]  }
   0x1   :  { %9 = vsyncpa [#allocation3 + $0x1], 0 }
   0x2   :  { %10 = vsyncpa [#allocation6], 0 }
   0x3   :  { %12 = vsyncpa [#allocation6 + $0x1], 0 }
   0x4   :  { %13 = vsyncpa [#allocation4], 0 }
   0x5   :  { %15 = vsyncpa [#allocation4 + $0x1], 0  ;;  %s525_s9 = smov 0   ;;  %s527_s10 = smov 0  }
   0x6   :  { %s529_s11 = smov 0   ;;  %s531_s12 = smov 0  }
   0x7 LB: > { %s546_s13 = sadd.s32 4294967295, %s505_s12   ;;  %s309_s14 = sadd.s32 4294967294, %s505_s12   ;;  %s505_s12 = sphi %s531_s12, %s755_s12   ;;  %s501_s11 = sphi %s529_s11, %s754_s11   ;;  %s497_s10 = sphi %s527_s10, %s753_s10   ;;  %s493_s9 = sphi %s525_s9, %s752_s9  }
   0x8   : > { %s550_s15 = sadd.s32 1, %s505_s12   ;;  %s28_s16 = sadd.s32 1, %s501_s11 }
   0x9   : > { %s25_s17 = ssub.s32 %s505_s12, %s550_s15  ;;  %p35_p0 = scmp.ne.s32.totalorder %s501_s11, %s497_s10 }
   0xa   : > { %p26_p1 = scmp.eq.s32.totalorder %s25_s17, 0  ;;  %p36_p2 = scmp.eq.s32.totalorder %s505_s12, 0 }
   0xb   : > { %p41_p3 = scmp.ne.s32.totalorder %s497_s10, %s493_s9  ;;  %p42_p4 = scmp.eq.s32.totalorder %s546_s13, 0 }
   0xc   : > { %s562_s18 = scalar_select %p26_p1, %s501_s11, %s28_s16  }
   0xd   : > { %p564_p5 = por %p36_p2, %p35_p0  ;;  %p568_p6 = por %p42_p4, %p41_p3 }
   0xe   : > { %p91_p7 = scmp.eq.s32.totalorder %s546_s13, 1  ;;  %p97_p8 = scmp.eq.s32.totalorder %s309_s14, 1 }
   0xf   : > { %s740_s20 = scalar_select %p568_p6, 1, 0 }
  0x10   : > { %p341_p10 = scmp.lt.s32.totalorder %s505_s12, 2  ;;  %p575_p11 = por %p91_p7, %p35_p0 }
  0x11   : > { %p579_p12 = por %p97_p8, %p41_p3  ;;  %s584_s23 = sand.u32 1, %s501_s11  }
  0x12   : > { %s741_s21 = scalar_select %p575_p11, 1, 0 }
  0x13   : > { %s742_s22 = scalar_select %p579_p12, 1, 0 }
  0x14   : > { %s313_s24 = sshll.u32 %s505_s12, 7  ;;  %s312_s25 = sshll.u32 %s584_s23, 3 }
  0x15   : > { %s593_s28 = scalar_lea.hbm %s734_s0, %s313_s24  ;;  %s121_s29 = scalar_lea.vmem [#allocation2], %s312_s25 }
  0x16   : > { %s128_s30 = sshll.u32 %s121_s29, 4  ;;  %p599_p13 = pnand %p341_p10, %p564_p5  ;;  %s603_s30 = int_to_ptr.vmem [resolvable:$true] %s128_s30 }
  0x17   : > { %s118_s4 = scalar_lea.sflag [#allocation3], %s584_s23  ;;  %s375_s5 = scalar_lea.hbm %s593_s28, 128 }
  0x18   : > { %p376_p2 = scmp.ne.s32.totalorder %s593_s28, %s375_s5  ;;  %p377_p3 = pneg %p599_p13 }
  0x19   : > { %s380_s8 = scalar_lea.hbm %s734_s0, 256  ;;  %p381_p5 = scmp.lt.u32.totalorder %s593_s28, %s734_s0 }
  0x1a   : > { %p378_p4 = pnand %p377_p3, %p376_p2  ;;  %p382_p8 = scmp.lt.u32.totalorder %s380_s8, %s375_s5 }
  0x1b   : > { %p384_p9 = scmp.lt.u32.totalorder %s375_s5, %s593_s28 }
  0x1c   : > { %p379_p7 = pneg %p378_p4  ;;  %p383_p10 = por %p382_p8, %p381_p5 }
  0x1e   : > { %p385_p0 = por %p384_p9, %p383_p10 }
  0x20   : > { %p386_p1 = pnand %p385_p0, %p379_p7 }
  0x22   : > { %389 = shalt.err (!%p386_p1)
}
  0x23   : > { %s390_s17 = scalar_lea.vmem %s603_s30, 128  ;;  %s507_s19 = smov [#allocation2]  }
  0x24   : > { %p391_p2 = scmp.ne.s32.totalorder %s603_s30, %s390_s17  ;;  %s395_s26 = sshll.u32 %s507_s19, 4  ;;  %s396_s26 = int_to_ptr.vmem [resolvable:$false] %s395_s26 }
  0x25   : > { %s397_s27 = scalar_lea.vmem %s396_s26, 256  ;;  %p398_p11 = scmp.lt.s32.totalorder %s603_s30, %s396_s26 }
  0x26   : > { %p393_p4 = pnand %p391_p2, %p377_p3  ;;  %p399_p5 = scmp.lt.s32.totalorder %s397_s27, %s390_s17 }
  0x28   : > { %p394_p12 = pneg %p393_p4  ;;  %p400_p8 = por %p399_p5, %p398_p11 }
  0x2a   : > { %p401_p9 = pnand %p400_p8, %p394_p12 }
  0x2c   : > { %404 = shalt.err (!%p401_p9)
}
  0x2d   : > { %333 = dma.hbm_to_vmem [thread:$0]  (!%p599_p13), %s593_s28, 128, %s603_s30, %s118_s4  }
  0x2e   : > { %p744_p0 = scmp.lt.s32.totalorder %s505_s12, 3  ;;  %p745_p1 = scmp.ge.s32.totalorder %s505_s12, 1 }
  0x2f   : > { %s646_s7 = scalar_lea.hbm %s735_s1, %s313_s24  ;;  %s139_s8 = scalar_lea.vmem [#allocation5], %s312_s25 }
  0x30   : > { %p637_p7 = pnand %p745_p1, %p744_p0  ;;  %s146_s14 = sshll.u32 %s139_s8, 4  ;;  %s147_s14 = int_to_ptr.vmem [resolvable:$true] %s146_s14 }
  0x31   : > { %s136_s28 = scalar_lea.sflag [#allocation6], %s584_s23  ;;  %s405_s30 = scalar_lea.hbm %s646_s7, 128 }
  0x32   : > { %s746_s29 = scalar_select %p637_p7, 1, 0 }
  0x33   : > { %p406_p11 = scmp.ne.s32.totalorder %s646_s7, %s405_s30  ;;  %s410_s24 = scalar_lea.hbm %s735_s1, 256 }
  0x34   : > { %p411_p2 = scmp.lt.u32.totalorder %s646_s7, %s735_s1  ;;  %p412_p4 = scmp.lt.u32.totalorder %s410_s24, %s405_s30 }
  0x35   : > { %p408_p12 = pnand %p406_p11, %p377_p3  ;;  %p414_p8 = scmp.lt.u32.totalorder %s405_s30, %s646_s7 }
  0x36   : > { %p413_p5 = por %p412_p4, %p411_p2 }
  0x37   : > { %p409_p10 = pneg %p408_p12 }
  0x38   : > { %p415_p9 = por %p414_p8, %p413_p5 }
  0x3a   : > { %p416_p0 = pnand %p415_p9, %p409_p10 }
  0x3c   : > { %419 = shalt.err (!%p416_p0)
}
  0x3d   : > { %s420_s23 = scalar_lea.vmem %s147_s14, 128  ;;  %s508_s25 = smov [#allocation5]  }
  0x3e   : > { %p421_p1 = scmp.ne.s32.totalorder %s147_s14, %s420_s23  ;;  %s425_s26 = sshll.u32 %s508_s25, 4  ;;  %s426_s26 = int_to_ptr.vmem [resolvable:$false] %s425_s26 }
  0x3f   : > { %s427_s27 = scalar_lea.vmem %s426_s26, 256  ;;  %p428_p6 = scmp.lt.s32.totalorder %s147_s14, %s426_s26 }
  0x40   : > { %p423_p11 = pnand %p421_p1, %p377_p3  ;;  %p429_p7 = scmp.lt.s32.totalorder %s427_s27, %s420_s23 }
  0x42   : > { %p424_p12 = pneg %p423_p11  ;;  %p430_p2 = por %p429_p7, %p428_p6 }
  0x44   : > { %p431_p4 = pnand %p430_p2, %p424_p12 }
  0x46   : > { %434 = shalt.err (!%p431_p4)
}
  0x47   : > { %336 = dma.hbm_to_vmem [thread:$0]  (!%p599_p13), %s646_s7, 128, %s147_s14, %s136_s28  }
  0x48   : > { %p747_p10 = scmp.ne.s32.totalorder %s746_s29, 0 }
  0x49   : > { %s673_s5 = sand.u32 (!%p747_p10), 1, %s497_s10   ;;  %p748_p3 = scmp.ne.s32.totalorder (!%p747_p10), %s740_s20, 0 }
  0x4a   : > { %155 = sbr.rel (%p747_p10) target bundleno = 110 (0x6e), region = 28  ;;  %s317_s6 = sshll.u32 (!%p747_p10), %s673_s5, 3 }
  0x4b   : > { %s158_s8 = scalar_lea.sflag (!%p747_p10), [#allocation3], %s673_s5  ;;  %s161_s30 = scalar_lea.vmem (!%p747_p10), [#allocation2], %s317_s6 }
  0x51   : > { %480 = dma.done.wait (%p748_p3), %s158_s8, 128  }
  0x52   : > { %482 = vsyncadd (%p748_p3), %s158_s8, 4294967168  ;;  %s167_s3 = scalar_lea.sflag [#allocation6], %s673_s5  ;;  %s170_s7 = scalar_lea.vmem [#allocation5], %s317_s6 }
  0x53   : > { %484 = dma.done.wait (%p748_p3), %s167_s3, 128  }
  0x54   : > { %486 = vsyncadd (%p748_p3), %s167_s3, 4294967168  ;;  %v196_v0 = vld [vmem:[%s161_s30] sm:$0xff]  ;;  %v197_v1 = vld [vmem:[%s170_s7] sm:$0xff]  ;;  %s195_s29 = scalar_lea.vmem [#allocation7], %s317_s6  ;;  %s321_s28 = sshll.u32 %s546_s13, 7 }
  0x55   : > { %s216_s14 = sshll.u32 %s195_s29, 4  ;;  %v198_v2 = vsub.f32 %v196_v0, %v197_v1  ;;  %s692_s20 = scalar_lea.hbm %s736_s2, %s321_s28  ;;  %s687_s14 = int_to_ptr.vmem [resolvable:$true] %s216_s14 }
  0x56   : > { %s203_s24 = scalar_lea.sflag [#allocation4], %s673_s5  ;;  %s435_s17 = scalar_lea.vmem %s687_s14, 128 }
  0x57   : > { %v199_v3 = vmul.f32 %v198_v2, %v198_v2  ;;  %p436_p6 = scmp.ne.s32.totalorder %s687_s14, %s435_s17  ;;  %p749_p13 = scmp.ne.s32.totalorder %s741_s21, 0 }
  0x58   : > { %s509_s13 = smov [#allocation7]  }
  0x59   : > { %201 = vst [vmem:[%s195_s29] sm:$0xff] %v199_v3  ;;  %p437_p7 = pnand %p436_p6, %p749_p13  ;;  %s439_s19 = sshll.u32 %s509_s13, 4  ;;  %s440_s19 = int_to_ptr.vmem [resolvable:$false] %s439_s19 }
  0x5a   : > { %s441_s23 = scalar_lea.vmem %s440_s19, 256  ;;  %p442_p8 = scmp.lt.s32.totalorder %s687_s14, %s440_s19 }
  0x5b   : > { %p438_p5 = pneg %p437_p7  ;;  %p443_p9 = scmp.lt.s32.totalorder %s441_s23, %s435_s17 }
  0x5d   : > { %p444_p0 = por %p443_p9, %p442_p8 }
  0x5f   : > { %p445_p1 = pnand %p444_p0, %p438_p5 }
  0x61   : > { %448 = shalt.err (!%p445_p1)
}
  0x62   : > { %s449_s25 = scalar_lea.hbm %s692_s20, 128  ;;  %s453_s5 = scalar_lea.hbm %s736_s2, 256 }
  0x63   : > { %p450_p11 = scmp.ne.s32.totalorder %s692_s20, %s449_s25  ;;  %p454_p4 = scmp.lt.u32.totalorder %s692_s20, %s736_s2 }
  0x64   : > { %p455_p10 = scmp.lt.u32.totalorder %s453_s5, %s449_s25  ;;  %p457_p6 = scmp.lt.u32.totalorder %s449_s25, %s692_s20 }
  0x65   : > { %p451_p12 = pnand %p450_p11, %p749_p13 }
  0x66   : > { %p456_p3 = por %p455_p10, %p454_p4 }
  0x67   : > { %p452_p2 = pneg %p451_p12 }
  0x68   : > { %p458_p7 = por %p457_p6, %p456_p3 }
  0x6a   : > { %p459_p5 = pnand %p458_p7, %p452_p2 }
  0x6c   : > { %462 = shalt.err (!%p459_p5)
}
  0x6d   : > { %328 = dma.vmem_to_hbm [thread:$0]  (%p749_p13), %s687_s14, 128, %s692_s20, %s203_s24  }
  0x6e PF: > { %s228_s30 = sand.u32 1, %s493_s9   ;;  %p750_p8 = scmp.ne.s32.totalorder %s742_s22, 0 }
  0x6f   : > { %p751_p9 = scmp.ge.s32.totalorder %s505_s12, 2  ;;  %s229_s3 = scalar_lea.sflag [#allocation4], %s228_s30 }
  0x71   : > { %p338_p0 = pnand %p751_p9, %p750_p8 }
  0x73   : > { %488 = dma.done.wait (!%p338_p0), %s229_s3, 128  }
  0x74   : > { %490 = vsyncadd (!%p338_p0), %s229_s3, 4294967168  ;;  %p18_p1 = scmp.ge.s32.totalorder %s550_s15, 4   ;;  %s752_s9 = smov %s497_s10 }
  0x75   : > { %s753_s10 = smov %s501_s11  ;;  %s754_s11 = smov %s562_s18 }
  0x76   : > { %s755_s12 = smov %s550_s15  ;;  %20 = sbr.rel (!%p18_p1) target bundleno = 7 (0x7), region = 86 }
  0x7d   :  { %234 = vsyncpa [#allocation3], 1 }
  0x7e   :  { %236 = vsyncpa [#allocation3 + $0x1], 1 }
  0x7f   :  { %237 = vsyncpa [#allocation6], 1 }
  0x80   :  { %239 = vsyncpa [#allocation6 + $0x1], 1 }
  0x81   :  { %240 = vsyncpa [#allocation4], 1 }
  0x82   :  { %242 = vsyncpa [#allocation4 + $0x1], 1 }

</bundles_post_ra>
